<compile_context>
chip_gen: v7x
topology: tpu7x:2x2x1
jax: 0.10.0
libtpu: 0.0.40
codegen_flags: <defaults>
</compile_context>

<pallas_src>
import functools
import math

import jax
import jax.numpy as jnp
import numpy as np
from jax.experimental import pallas as pl
from jax.experimental.pallas import tpu as pltpu


def _struct_power(cnc, lambda_val):
    """cnc ** lambda_val with a VPU-friendly path for small integer exponents."""
    if lambda_val == 1.0:
        return cnc
    if float(lambda_val).is_integer() and 1.0 < float(lambda_val) <= 4.0:
        out = cnc
        for _ in range(int(lambda_val) - 1):
            out = out * cnc                       # VALU multiplies, no EUP exp/log
        return out
    return jnp.power(cnc, jnp.float32(lambda_val))


def _ada_gcn_kernel(ms_ref, keep_t_ref, cnc_ref, max_c_ref, dis_d_ref, dis_s_ref,
                    xw_ref, bias_ref, o_ref, *, lambda_val, matmul_dtype):
    """Fused structural coefficients + edge weights + gcn_norm + propagation for one
    block of TM destination rows.

    ms_ref:     (TM, N)   f32  mean cosine similarity rows (symmetric matrix).
    keep_t_ref: (TM, N)   bf16 keep_t[dst, src] = 1 iff dst is in top-k of row src.
    cnc_ref:    (TM, N)   f32  common-neighbour counts (exact integers), rows.
    max_c_ref:  (1, 1)    f32  global max of the common-neighbour counts (>= 1).
    dis_d_ref:  (TM, 1)   f32  deg^-0.5 for this block's dst rows (global reduction, XLA).
    dis_s_ref:  (1, N)    f32  deg^-0.5 for all src nodes.
    xw_ref:     (N, BLp)  matmul_dtype  (x @ W), lane-dense, 128-padded, grid-resident.
    bias_ref:   (1, BLp)  f32  bias tiled across batch, zero in pad lanes, resident.
    o_ref:      (TM, BLp) f32  lane-dense output rows.
    """
    ms = ms_ref[...]
    keep_t = keep_t_ref[...].astype(jnp.float32)       # exact 0/1 mask (bf16 in HBM)
    cnc = cnc_ref[...]
    inv_max_c = 1.0 / max_c_ref[...]                    # (1,1); max_c >= 1 (self loops)

    # Structural coefficients.  keep_t excludes the diagonal and keep_t <= adj, so the
    # reference's `adj > 0 & off-diagonal` conditions are absorbed by the keep_t mask
    # below (no (N,N) iota / adjacency temporaries needed).
    powc = _struct_power(cnc, lambda_val)
    s_coeff = jnp.where(cnc > 1.0, (cnc * inv_max_c) * powc, 0.0)

    # Fused edge weights directly in [dst, src] orientation (ms / s_coeff symmetric).
    w_t = jnp.where(keep_t > 0.0, ms + s_coeff, 0.0)    # (TM, N)

    # gcn_norm applied in-register; the normalized adjacency never touches HBM.
    a_hat = (dis_d_ref[...] * w_t) * dis_s_ref[...]

    # Message passing (aggr='add').  Cast right before the dot (v5e-friendly); bf16
    # operands by default for 2-4x MXU throughput, f32 accumulation always.
    msg = jnp.dot(a_hat.astype(matmul_dtype), xw_ref[...],
                  preferred_element_type=jnp.float32)   # (TM, BLp)
    o_ref[...] = msg + bias_ref[...]


def _vmem_limit_bytes():
    """Generation-aware scoped-VMEM cap (~85% of physical)."""
    try:
        cap = int(pltpu.get_tpu_info().vmem_capacity_bytes)
    except Exception:                                   # interpret mode / older runtimes
        cap = 128 << 20
    return int(0.85 * cap)


def _graph_inputs(xp, k, lambda_val):
    """XLA-side per-level graph construction (cosine graph, exact top-k, common
    neighbours, and the *global* reductions max_c / deg^-0.5 that a parallel row grid
    cannot compute per block)."""
    n, b, l = xp.shape
    nrm = jnp.sqrt(jnp.sum(xp * xp, axis=-1, keepdims=True))
    xn = (xp / jnp.maximum(nrm, 1e-12)).reshape(n, b * l)     # F.normalize(p=2, dim=-1)
    ms = jnp.dot(xn, xn.T) / b                                # one matmul, K = B*L

    eye = jnp.eye(n, dtype=bool)
    _, idx = jax.lax.top_k(jnp.where(eye, -jnp.inf, ms), k)   # exact k neighbours / row
    # one-hot + sum instead of a scatter (scatter lowers poorly on TPU).
    keep = jnp.sum(jax.nn.one_hot(idx, n, dtype=jnp.float32), axis=1)   # (N, N)
    keep_t = keep.T                                           # keep_t[dst, src]

    nbr = jnp.minimum(keep + keep_t + jnp.eye(n, dtype=jnp.float32), 1.0)
    cnc = jnp.dot(nbr, nbr)                                   # symmetric 0/1 -> exact counts
    max_c = jnp.max(cnc)

    # deg / dis depend on *all* rows of the fused edge weights, so the symmetric-norm
    # scales are produced here, outside the ("parallel",) row grid.
    s_coeff = jnp.where(cnc > 1.0, (cnc / max_c) * _struct_power(cnc, lambda_val), 0.0)
    w_t = jnp.where(keep_t > 0.0, ms + s_coeff, 0.0)          # [dst, src]
    deg = jnp.sum(w_t, axis=-1, keepdims=True)                # (N, 1) in-degree at dst
    dis = jnp.where(deg > 0.0, deg ** -0.5, 0.0)

    return (ms, keep_t.astype(jnp.bfloat16), cnc,
            max_c.reshape(1, 1), dis, dis.reshape(1, n))


@functools.partial(jax.jit, static_argnames=("num_levels", "lambda_val", "matmul_dtype"))
def dynamic_graph_embedding(x, weight, bias, *, num_levels=1, lambda_val=1.0,
                            matmul_dtype=jnp.bfloat16):
    """x: (batch, seq_len, num_nodes) f32 -> (batch, seq_len, num_nodes) f32."""
    batch, seq_len, num_nodes = x.shape
    k = max(int(num_nodes * 0.3), 1)
    n, bl = num_nodes, batch * seq_len
    blp = ((bl + 127) // 128) * 128                   # lane-dense: pad B*L to 128 multiple
    tm = n if n <= 128 else 128                       # dst-row block (full rows at test size)
    grid = (pl.cdiv(n, tm),)

    call = pl.pallas_call(
        functools.partial(_ada_gcn_kernel, lambda_val=lambda_val,
                          matmul_dtype=matmul_dtype),
        out_shape=jax.ShapeDtypeStruct((n, blp), jnp.float32),
        grid_spec=pltpu.PrefetchScalarGridSpec(
            num_scalar_prefetch=0,
            grid=grid,
            in_specs=[
                # streamed per dst-row block (default double-buffering; Buffered(3) on v7x)
                pl.BlockSpec((tm, n), lambda i: (i, 0)),      # ms rows        f32
                pl.BlockSpec((tm, n), lambda i: (i, 0)),      # keep_t rows    bf16 mask
                pl.BlockSpec((tm, n), lambda i: (i, 0)),      # cnc rows       f32
                pl.BlockSpec((1, 1), lambda i: (0, 0)),       # max_c          f32
                pl.BlockSpec((tm, 1), lambda i: (i, 0)),      # dis[dst rows]  f32
                # grid-resident (index map constant -> fetched once)
                pl.BlockSpec((1, n), lambda i: (0, 0)),       # dis[src]       f32
                pl.BlockSpec((n, blp), lambda i: (0, 0)),     # x @ W, lane-dense
                pl.BlockSpec((1, blp), lambda i: (0, 0)),     # bias tiled + padded
            ],
            out_specs=pl.BlockSpec((tm, blp), lambda i: (i, 0)),
        ),
        compiler_params=pltpu.CompilerParams(
            dimension_semantics=("parallel",),                # lets v7x use both TCs
            vmem_limit_bytes=_vmem_limit_bytes(),
        ),
    )

    w = weight.astype(jnp.float32)
    bias_p = jnp.pad(jnp.tile(bias.astype(jnp.float32), batch),
                     (0, blp - bl)).reshape(1, blp)
    xp = jnp.transpose(x, (2, 0, 1)).astype(jnp.float32)      # (N, B, L): AdaGCNConv layout

    for _ in range(num_levels):                               # shared gc_module weights
        ms, keep_t, cnc, max_c, dis_d, dis_s = _graph_inputs(xp, k, lambda_val)
        xw = jnp.einsum("nbl,lo->nbo", xp, w).reshape(n, bl)  # x @ W: one batched matmul
        xw_p = jnp.pad(xw, ((0, 0), (0, blp - bl))).astype(matmul_dtype)
        out_flat = call(ms, keep_t, cnc, max_c, dis_d, dis_s, xw_p, bias_p)
        xp = out_flat[:, :bl].reshape(n, batch, seq_len)

    return jnp.transpose(xp, (1, 2, 0))                       # (B, L, N)


def _reference(x, weight, bias, *, num_levels=1, lambda_val=1.0):
    """Pure-JAX f32 reference mirroring the PyTorch forward (dense formulation)."""
    batch, seq_len, num_nodes = x.shape
    k = max(int(num_nodes * 0.3), 1)
    eye = jnp.eye(num_nodes, dtype=bool)

    def one_level(xp):                                        # xp: (N, B, L)
        nrm = jnp.sqrt(jnp.sum(xp * xp, axis=-1, keepdims=True))
        xn = xp / jnp.maximum(nrm, 1e-12)
        ms = jnp.mean(jnp.einsum("nbl,mbl->bnm", xn, xn), axis=0)  # (N, N)
        vals = jnp.where(eye, -jnp.inf, ms)
        _, idx = jax.lax.top_k(vals, k)
        keep = jnp.zeros((num_nodes, num_nodes), bool)
        keep = keep.at[jnp.arange(num_nodes)[:, None], idx].set(True)
        keep_f = keep.astype(jnp.float32)
        adj = jnp.clip(keep_f + keep_f.T, 0.0, 1.0)
        nbrm = jnp.clip(adj + jnp.eye(num_nodes), 0.0, 1.0)
        cnc = nbrm @ nbrm.T
        valid = (adj > 0) & (cnc > 1)
        s = jnp.where(valid, (cnc / jnp.max(cnc)) * cnc ** lambda_val, 0.0)
        w_sd = jnp.where(keep, ms + s, 0.0)                   # [src, dst]
        deg = jnp.sum(w_sd, axis=0)                           # in-degree at dst
        dis = jnp.where(deg > 0, deg ** -0.5, 0.0)
        w_norm = dis[:, None] * w_sd * dis[None, :]
        xw = jnp.einsum("nbl,lo->nbo", xp, weight)
        return jnp.einsum("sd,sbl->dbl", w_norm, xw) + bias

    xp = jnp.transpose(x, (2, 0, 1))
    for _ in range(num_levels):
        xp = one_level(xp)
    return jnp.transpose(xp, (1, 2, 0))


if __name__ == "__main__":
    jax.config.update("jax_default_matmul_precision", "highest")  # accurate XLA-side graph math

    B, L, N = 2, 32, 8                                        # batch, seq_len, num_nodes
    key = jax.random.PRNGKey(0)
    kx, kw, kb = jax.random.split(key, 3)
    x = jax.random.normal(kx, (B, L, N), dtype=jnp.float32)

    # AdaGCNConv parameters: weight (seq_len, seq_len) glorot-uniform, small bias.
    limit = math.sqrt(6.0 / (L + L))
    weight = jax.random.uniform(kw, (L, L), jnp.float32, -limit, limit)
    bias = 0.1 * jax.random.normal(kb, (L,), dtype=jnp.float32)

    ref1 = _reference(x, weight, bias, num_levels=1, lambda_val=1.0)
    ref2 = _reference(x, weight, bias, num_levels=2, lambda_val=1.0)

    # f32 MXU-operand path: tight parity check against the pure-JAX reference.
    out_f32 = dynamic_graph_embedding(x, weight, bias, num_levels=1, lambda_val=1.0,
                                      matmul_dtype=jnp.float32)
    out_f32 = jax.block_until_ready(out_f32)
    assert out_f32.shape == (B, L, N) and out_f32.dtype == jnp.float32
    np.testing.assert_allclose(np.asarray(out_f32), np.asarray(ref1), rtol=2e-3, atol=2e-3)

    out2_f32 = dynamic_graph_embedding(x, weight, bias, num_levels=2, lambda_val=1.0,
                                       matmul_dtype=jnp.float32)
    out2_f32 = jax.block_until_ready(out2_f32)
    np.testing.assert_allclose(np.asarray(out2_f32), np.asarray(ref2), rtol=2e-3, atol=2e-3)

    # Default bf16 MXU-operand path (review's highest-impact change): operand rounding
    # bounds per-element error at ~2^-8 of the row's L1 mass, so the tolerance is looser.
    out_bf16 = dynamic_graph_embedding(x, weight, bias, num_levels=1, lambda_val=1.0)
    out_bf16 = jax.block_until_ready(out_bf16)
    np.testing.assert_allclose(np.asarray(out_bf16), np.asarray(ref1), rtol=2e-2, atol=5e-2)

    # Multi-level bf16 path: the top-k graph selection is discrete, so bf16 rounding can
    # legitimately pick a different level-2 graph than the all-f32 reference; only check
    # that it executes and produces finite values of the right shape.
    out2_bf16 = dynamic_graph_embedding(x, weight, bias, num_levels=2, lambda_val=1.0)
    out2_bf16 = jax.block_until_ready(out2_bf16)
    assert out2_bf16.shape == (B, L, N) and bool(jnp.all(jnp.isfinite(out2_bf16)))

    print("KERNEL_OK")
</pallas_src>

<mosaic_0001>
module attributes {stable_mosaic.version = 11 : i64} {
  func.func @_ada_gcn_kernel(%arg0: i32, %arg1: memref<8x8xf32, #tpu.memory_space<vmem>>, %arg2: memref<8x8xbf16, #tpu.memory_space<vmem>>, %arg3: memref<8x8xf32, #tpu.memory_space<vmem>>, %arg4: memref<1x1xf32, #tpu.memory_space<vmem>>, %arg5: memref<8x1xf32, #tpu.memory_space<vmem>>, %arg6: memref<1x8xf32, #tpu.memory_space<vmem>>, %arg7: memref<8x128xf32, #tpu.memory_space<vmem>>, %arg8: memref<1x128xf32, #tpu.memory_space<vmem>>, %arg9: memref<8x128xf32, #tpu.memory_space<vmem>>) attributes {dimension_semantics = [#tpu.dimension_semantics<parallel>], iteration_bounds = array<i64: 1>, scalar_prefetch = 0 : i64, scratch_operands = 0 : i64, tpu.core_type = #tpu.core_type<tc>, window_params = [{transform_indices = @transform_0, window_bounds = array<i64: 8, 8>}, {transform_indices = @transform_1, window_bounds = array<i64: 8, 8>}, {transform_indices = @transform_2, window_bounds = array<i64: 8, 8>}, {pipeline_mode = #tpu.pipeline_mode<synchronous>, transform_indices = @transform_3, window_bounds = array<i64: 1, 1>}, {transform_indices = @transform_4, window_bounds = array<i64: 8, 1>}, {pipeline_mode = #tpu.pipeline_mode<synchronous>, transform_indices = @transform_5, window_bounds = array<i64: 1, 8>}, {pipeline_mode = #tpu.pipeline_mode<synchronous>, transform_indices = @transform_6, window_bounds = array<i64: 8, 128>}, {pipeline_mode = #tpu.pipeline_mode<synchronous>, transform_indices = @transform_7, window_bounds = array<i64: 1, 128>}, {transform_indices = @transform_8, window_bounds = array<i64: 8, 128>}]} {
    %c0 = arith.constant 0 : index
    %c0_0 = arith.constant 0 : index
    %0 = vector.load %arg1[%c0, %c0_0] : memref<8x8xf32, #tpu.memory_space<vmem>>, vector<8x8xf32>
    %c0_1 = arith.constant 0 : index
    %c0_2 = arith.constant 0 : index
    %1 = vector.load %arg2[%c0_1, %c0_2] : memref<8x8xbf16, #tpu.memory_space<vmem>>, vector<8x8xbf16>
    %2 = arith.extf %1 : vector<8x8xbf16> to vector<8x8xf32>
    %c0_3 = arith.constant 0 : index
    %c0_4 = arith.constant 0 : index
    %3 = vector.load %arg3[%c0_3, %c0_4] : memref<8x8xf32, #tpu.memory_space<vmem>>, vector<8x8xf32>
    %c0_5 = arith.constant 0 : index
    %c0_6 = arith.constant 0 : index
    %4 = vector.load %arg4[%c0_5, %c0_6] : memref<1x1xf32, #tpu.memory_space<vmem>>, vector<1x1xf32>
    %cst = arith.constant 1.000000e+00 : f32
    %5 = vector.broadcast %cst : f32 to vector<1x1xf32>
    %6 = arith.divf %5, %4 : vector<1x1xf32>
    %cst_7 = arith.constant 1.000000e+00 : f32
    %7 = vector.broadcast %cst_7 : f32 to vector<8x8xf32>
    %8 = arith.cmpf ogt, %3, %7 : vector<8x8xf32>
    %9 = vector.broadcast %6 : vector<1x1xf32> to vector<8x8xf32>
    %10 = arith.mulf %3, %9 : vector<8x8xf32>
    %11 = arith.mulf %10, %3 : vector<8x8xf32>
    %cst_8 = arith.constant 0.000000e+00 : f32
    %12 = vector.broadcast %cst_8 : f32 to vector<8x8xf32>
    %13 = arith.select %8, %11, %12 : vector<8x8xi1>, vector<8x8xf32>
    %cst_9 = arith.constant 0.000000e+00 : f32
    %14 = vector.broadcast %cst_9 : f32 to vector<8x8xf32>
    %15 = arith.cmpf ogt, %2, %14 : vector<8x8xf32>
    %16 = arith.addf %0, %13 : vector<8x8xf32>
    %cst_10 = arith.constant 0.000000e+00 : f32
    %17 = vector.broadcast %cst_10 : f32 to vector<8x8xf32>
    %18 = arith.select %15, %16, %17 : vector<8x8xi1>, vector<8x8xf32>
    %c0_11 = arith.constant 0 : index
    %c0_12 = arith.constant 0 : index
    %19 = vector.load %arg5[%c0_11, %c0_12] : memref<8x1xf32, #tpu.memory_space<vmem>>, vector<8x1xf32>
    %20 = vector.broadcast %19 : vector<8x1xf32> to vector<8x8xf32>
    %21 = arith.mulf %20, %18 : vector<8x8xf32>
    %c0_13 = arith.constant 0 : index
    %c0_14 = arith.constant 0 : index
    %22 = vector.load %arg6[%c0_13, %c0_14] : memref<1x8xf32, #tpu.memory_space<vmem>>, vector<1x8xf32>
    %23 = vector.broadcast %22 : vector<1x8xf32> to vector<8x8xf32>
    %24 = arith.mulf %21, %23 : vector<8x8xf32>
    %c0_15 = arith.constant 0 : index
    %c0_16 = arith.constant 0 : index
    %25 = vector.load %arg7[%c0_15, %c0_16] : memref<8x128xf32, #tpu.memory_space<vmem>>, vector<8x128xf32>
    %cst_17 = arith.constant dense<0.000000e+00> : vector<8x128xf32>
    %26 = tpu.matmul %24, %25, %cst_17 {dimension_numbers = #tpu.dot_dimension_numbers<[1], [0], [0], [1], [0, 0, 1, 1], [], []>, precision = #tpu.contract_precision<fp32>} : vector<8x8xf32>, vector<8x128xf32>, vector<8x128xf32> -> vector<8x128xf32>
    %c0_18 = arith.constant 0 : index
    %c0_19 = arith.constant 0 : index
    %27 = vector.load %arg8[%c0_18, %c0_19] : memref<1x128xf32, #tpu.memory_space<vmem>>, vector<1x128xf32>
    %28 = vector.broadcast %27 : vector<1x128xf32> to vector<8x128xf32>
    %29 = arith.addf %26, %28 : vector<8x128xf32>
    %c0_20 = arith.constant 0 : index
    %c0_21 = arith.constant 0 : index
    %30 = vector.load %arg9[%c0_20, %c0_21] : memref<8x128xf32, #tpu.memory_space<vmem>>, vector<8x128xf32>
    tpu.vector_store %arg9[%c0_20, %c0_21], %29 {strides = array<i32>} : memref<8x128xf32, #tpu.memory_space<vmem>>, vector<8x128xf32>,
    return
  }
  func.func @transform_0(%arg0: i32) -> (i32, i32) {
    %c0_i32 = arith.constant 0 : i32
    %c0_i32_0 = arith.constant 0 : i32
    return %arg0, %c0_i32 : i32, i32
  }
  func.func @transform_1(%arg0: i32) -> (i32, i32) {
    %c0_i32 = arith.constant 0 : i32
    %c0_i32_0 = arith.constant 0 : i32
    return %arg0, %c0_i32 : i32, i32
  }
  func.func @transform_2(%arg0: i32) -> (i32, i32) {
    %c0_i32 = arith.constant 0 : i32
    %c0_i32_0 = arith.constant 0 : i32
    return %arg0, %c0_i32 : i32, i32
  }
  func.func @transform_3(%arg0: i32) -> (i32, i32) {
    %c0_i32 = arith.constant 0 : i32
    %c0_i32_0 = arith.constant 0 : i32
    %c0_i32_1 = arith.constant 0 : i32
    return %c0_i32, %c0_i32_0 : i32, i32
  }
  func.func @transform_4(%arg0: i32) -> (i32, i32) {
    %c0_i32 = arith.constant 0 : i32
    %c0_i32_0 = arith.constant 0 : i32
    return %arg0, %c0_i32 : i32, i32
  }
  func.func @transform_5(%arg0: i32) -> (i32, i32) {
    %c0_i32 = arith.constant 0 : i32
    %c0_i32_0 = arith.constant 0 : i32
    %c0_i32_1 = arith.constant 0 : i32
    return %c0_i32, %c0_i32_0 : i32, i32
  }
  func.func @transform_6(%arg0: i32) -> (i32, i32) {
    %c0_i32 = arith.constant 0 : i32
    %c0_i32_0 = arith.constant 0 : i32
    %c0_i32_1 = arith.constant 0 : i32
    return %c0_i32, %c0_i32_0 : i32, i32
  }
  func.func @transform_7(%arg0: i32) -> (i32, i32) {
    %c0_i32 = arith.constant 0 : i32
    %c0_i32_0 = arith.constant 0 : i32
    %c0_i32_1 = arith.constant 0 : i32
    return %c0_i32, %c0_i32_0 : i32, i32
  }
  func.func @transform_8(%arg0: i32) -> (i32, i32) {
    %c0_i32 = arith.constant 0 : i32
    %c0_i32_0 = arith.constant 0 : i32
    return %arg0, %c0_i32 : i32, i32
  }
}

</mosaic_0001>

<bundles_post_ra>
// kernel: tile.8
= control target key start
LH: loop header
LB: loop body
LE: loop exit
PB: predicated region body
PF: predicated region fallthrough
CT: control target
= control target key end

     0   :  { %s22_s0 = inlined_call_operand.vmem [shape: f32[32], index: 0, kind: input, shape index: {}]   ;;  %s23_s1 = inlined_call_operand.vmem [shape: f32[2,32], index: 1, kind: output, shape index: {}]  }
   0x1   :  { %v4_v0 = vld [vmem:[%s22_s0] ss:$0 sm:$0xff] }
   0x2   :  { %5 = vst [vmem:[%s23_s1] sm:$0x3] %v4_v0 }

// kernel: tile.9
= control target key start
LH: loop header
LB: loop body
LE: loop exit
PB: predicated region body
PF: predicated region fallthrough
CT: control target
= control target key end

     0   :  { %vm7_vm0 = vcmask 261120   ;;  %vm13_vm1 = vcmask 523520   ;;  %s39_s0 = inlined_call_operand.vmem [shape: f32[2,32], index: 0, kind: input, shape index: {}]   ;;  %s40_s1 = inlined_call_operand.vmem [shape: f32[64], index: 1, kind: output, shape index: {}]  }
   0x1   :  { %v4_v0 = vld [vmem:[%s39_s0] sm:$0x3]  ;;  %s22_s0 = smov 32  }
   0x2   :  { %5 = vst [vmem:[#allocation1] sm:$0x3] %v4_v0 }
   0x9   :  { %v10_v1 = vld [vmem:[#allocation1 + $0x1] sm:$0x1]   ;;  %v6_v2 = vld [vmem:[#allocation1] sm:$0x1]  }
   0xa   :  { %11 = vrot.lane.b32.xlu0 %v10_v1, %s22_s0  ;;  %8 = vst.msk [vmem:[#allocation0] sm:$0x1] %vm7_vm0, %v6_v2  }
  0x7c   :  { %v12_v3 = vpop.permute.xlu0 %11  }
  0x7d   :  { %14 = vst.msk [vmem:[#allocation0] sm:$0x1] %vm13_vm1, %v12_v3  }
  0x84   :  { %v18_v4 = vld [vmem:[#allocation0] sm:$0x1] }
  0x85   :  { %20 = vst [vmem:[%s40_s1] sm:$0x1] %v18_v4 }

</bundles_post_ra>
